<compile_context>
chip_gen: v7x
topology: tpu7x:2x2x1
jax: 0.10.0
libtpu: 0.0.40
codegen_flags: <defaults>
</compile_context>

<pallas_src>
import functools

import jax
import jax.numpy as jnp
from jax import lax
from jax.experimental import pallas as pl
from jax.experimental.pallas import tpu as pltpu


def _round_up(x: int, m: int) -> int:
    return ((x + m - 1) // m) * m


def _lora_linear_kernel(x_ref, w_ref, b_ref, a_ref, bb_ref, o_ref,
                        acc_ref, xa_ref, *, alpha):
    """Grid = (M//tm, N//tn, K//tk); K is the (innermost) reduction axis.

    x_ref  : [tm, tk]   input tile
    w_ref  : [tn, tk]   weight tile in [out_dim, in_dim] layout
    b_ref  : [1,  tn]   bias tile (resident across i, k)
    a_ref  : [tk, r]    LoRA A tile (K-sliced)
    bb_ref : [r,  tn]   LoRA B tile (resident across K)
    o_ref  : [tm, tn]   output tile
    acc_ref: [tm, tn]   f32 base-matmul accumulator (VMEM scratch)
    xa_ref : [tm, r]    f32 LoRA intermediate accumulator (VMEM scratch)
    """
    k = pl.program_id(2)
    nk = pl.num_programs(2)

    @pl.when(k == 0)
    def _init():
        acc_ref[...] = jnp.zeros_like(acc_ref)
        xa_ref[...] = jnp.zeros_like(xa_ref)

    x = x_ref[...]

    # Base: x(tm,tk) @ W(tn,tk)^T  -- contract last dims of both, f32 accumulate on MXU.
    acc_ref[...] += lax.dot_general(
        x, w_ref[...],
        dimension_numbers=(((1,), (1,)), ((), ())),
        preferred_element_type=jnp.float32)

    # LoRA: accumulate xa = x @ A across the K reduction (tiny (tm, r) scratch).
    xa_ref[...] += jnp.dot(x, a_ref[...], preferred_element_type=jnp.float32)

    @pl.when(k == nk - 1)
    def _finalize():
        # alpha applied to the small (tm, r) intermediate; rank matmul kept in f32.
        lora = jnp.dot(alpha * xa_ref[...],
                       bb_ref[...].astype(jnp.float32),
                       preferred_element_type=jnp.float32)
        o_ref[...] = (acc_ref[...] + b_ref[...].astype(jnp.float32) + lora
                      ).astype(o_ref.dtype)


def linear_with_lora(x, weight, bias, lora_a, lora_b, alpha,
                     *, tm=128, tn=128, tk=512):
    """y = x @ weight.T + bias + alpha * (x @ lora_a @ lora_b)

    x       : [M, K]   (batch, in_dim)
    weight  : [N, K]   (PyTorch nn.Linear convention [out_dim, in_dim])
    bias    : [N]
    lora_a  : [K, r]
    lora_b  : [r, N]
    """
    M, K = x.shape
    N, K2 = weight.shape
    assert K == K2
    r = lora_a.shape[1]
    assert lora_a.shape[0] == K and lora_b.shape == (r, N)
    out_dtype = x.dtype

    # Clamp tiles to (padded) problem size; keep TPU alignment (8 sublanes, 128 lanes).
    tm = min(tm, _round_up(M, 8))
    tn = min(tn, _round_up(N, 128))
    tk = min(tk, _round_up(K, 128))

    Mp, Kp, Np = _round_up(M, tm), _round_up(K, tk), _round_up(N, tn)

    # Zero-padding is exact: padded K rows/cols contribute 0, padded N cols are sliced off.
    x_p = jnp.pad(x, ((0, Mp - M), (0, Kp - K)))
    w_p = jnp.pad(weight, ((0, Np - N), (0, Kp - K)))
    b_p = jnp.pad(bias, (0, Np - N)).reshape(1, Np)
    a_p = jnp.pad(lora_a, ((0, Kp - K), (0, 0)))
    bb_p = jnp.pad(lora_b, ((0, 0), (0, Np - N)))

    grid = (Mp // tm, Np // tn, Kp // tk)

    kernel = functools.partial(_lora_linear_kernel, alpha=float(alpha))

    bytes_accessed = (x_p.size * x_p.dtype.itemsize
                      + w_p.size * w_p.dtype.itemsize
                      + b_p.size * b_p.dtype.itemsize
                      + a_p.size * a_p.dtype.itemsize
                      + bb_p.size * bb_p.dtype.itemsize
                      + Mp * Np * jnp.dtype(out_dtype).itemsize)
    flops = 2 * Mp * Np * Kp + 2 * Mp * Kp * r * (Np // tn) + 2 * Mp * r * Np

    out_p = pl.pallas_call(
        kernel,
        out_shape=jax.ShapeDtypeStruct((Mp, Np), out_dtype),
        grid_spec=pltpu.PrefetchScalarGridSpec(
            num_scalar_prefetch=0,
            grid=grid,
            in_specs=[
                pl.BlockSpec((tm, tk), lambda i, j, k: (i, k)),   # x
                pl.BlockSpec((tn, tk), lambda i, j, k: (j, k)),   # W  [out_dim, in_dim]
                pl.BlockSpec((1, tn), lambda i, j, k: (0, j)),    # bias
                pl.BlockSpec((tk, r), lambda i, j, k: (k, 0)),    # LoRA A (K-sliced)
                pl.BlockSpec((r, tn), lambda i, j, k: (0, j)),    # LoRA B (K-resident)
            ],
            out_specs=pl.BlockSpec((tm, tn), lambda i, j, k: (i, j)),
            scratch_shapes=[
                pltpu.VMEM((tm, tn), jnp.float32),   # base accumulator
                pltpu.VMEM((tm, r), jnp.float32),    # xa accumulator
            ],
        ),
        compiler_params=pltpu.CompilerParams(
            dimension_semantics=("parallel", "parallel", "arbitrary")),
        cost_estimate=pl.CostEstimate(
            flops=flops, transcendentals=0, bytes_accessed=bytes_accessed),
    )(x_p, w_p, b_p, a_p, bb_p)

    return out_p[:M, :N]


if __name__ == "__main__":
    # Small but lane-friendly shapes (out_dim multiple of 128 keeps stores unmasked).
    batch, in_dim, out_dim, rank = 16, 256, 256, 8
    alpha = 2.0

    key = jax.random.PRNGKey(0)
    kx, kw, kb, ka, kbb = jax.random.split(key, 5)

    x = jax.random.normal(kx, (batch, in_dim), dtype=jnp.float32)

    # nn.Linear: weight [out_dim, in_dim], bias [out_dim].
    weight = jax.random.normal(kw, (out_dim, in_dim), dtype=jnp.float32) * 0.1
    bias = jax.random.normal(kb, (out_dim,), dtype=jnp.float32) * 0.1
    # LoRA: A = randn(in_dim, rank)/sqrt(rank); the module inits B = zeros, but a
    # small nonzero B is used here so the LoRA path is actually exercised.
    lora_a = jax.random.normal(ka, (in_dim, rank), dtype=jnp.float32) / jnp.sqrt(rank)
    lora_b = jax.random.normal(kbb, (rank, out_dim), dtype=jnp.float32) * 0.05

    out = linear_with_lora(x, weight, bias, lora_a, lora_b, alpha)
    out = jax.block_until_ready(out)

    # Pure-JAX reference (matches the PyTorch module's forward semantics).
    ref = x @ weight.T + bias + alpha * ((x @ lora_a) @ lora_b)
    assert out.shape == (batch, out_dim)
    assert jnp.allclose(out, ref, atol=1e-4, rtol=1e-4), "mismatch vs reference"

    print("KERNEL_OK")
</pallas_src>

<mosaic_0001>
module attributes {stable_mosaic.version = 11 : i64} {
  func.func @_lora_linear_kernel(%arg0: i32, %arg1: i32, %arg2: i32, %arg3: memref<16x256xf32, #tpu.memory_space<vmem>>, %arg4: memref<128x256xf32, #tpu.memory_space<vmem>>, %arg5: memref<1x128xf32, #tpu.memory_space<vmem>>, %arg6: memref<256x8xf32, #tpu.memory_space<vmem>>, %arg7: memref<8x128xf32, #tpu.memory_space<vmem>>, %arg8: memref<16x128xf32, #tpu.memory_space<vmem>>, %arg9: memref<16x128xf32, #tpu.memory_space<vmem>>, %arg10: memref<16x8xf32, #tpu.memory_space<vmem>>) attributes {dimension_semantics = [#tpu.dimension_semantics<parallel>, #tpu.dimension_semantics<parallel>, #tpu.dimension_semantics<arbitrary>], iteration_bounds = array<i64: 1, 2, 1>, scalar_prefetch = 0 : i64, scratch_operands = 2 : i64, tpu.core_type = #tpu.core_type<tc>, window_params = [{transform_indices = @transform_0, window_bounds = array<i64: 16, 256>}, {transform_indices = @transform_1, window_bounds = array<i64: 128, 256>}, {transform_indices = @transform_2, window_bounds = array<i64: 1, 128>}, {transform_indices = @transform_3, window_bounds = array<i64: 256, 8>}, {transform_indices = @transform_4, window_bounds = array<i64: 8, 128>}, {transform_indices = @transform_5, window_bounds = array<i64: 16, 128>}]} {
    %c0_i32 = arith.constant 0 : i32
    %0 = arith.cmpi eq, %arg2, %c0_i32 : i32
    %1 = arith.extui %0 : i1 to i32
    %c0_i32_0 = arith.constant 0 : i32
    %2 = arith.cmpi ne, %1, %c0_i32_0 : i32
    scf.if %2 {
      %cst_17 = arith.constant 0.000000e+00 : f32
      %17 = vector.broadcast %cst_17 : f32 to vector<16x128xf32>
      %c0_18 = arith.constant 0 : index
      %c0_19 = arith.constant 0 : index
      %18 = vector.load %arg9[%c0_18, %c0_19] : memref<16x128xf32, #tpu.memory_space<vmem>>, vector<16x128xf32>
      tpu.vector_store %arg9[%c0_18, %c0_19], %17 {strides = array<i32>} : memref<16x128xf32, #tpu.memory_space<vmem>>, vector<16x128xf32>,
      %cst_20 = arith.constant 0.000000e+00 : f32
      %19 = vector.broadcast %cst_20 : f32 to vector<16x8xf32>
      %c0_21 = arith.constant 0 : index
      %c0_22 = arith.constant 0 : index
      %20 = vector.load %arg10[%c0_21, %c0_22] : memref<16x8xf32, #tpu.memory_space<vmem>>, vector<16x8xf32>
      tpu.vector_store %arg10[%c0_21, %c0_22], %19 {strides = array<i32>} : memref<16x8xf32, #tpu.memory_space<vmem>>, vector<16x8xf32>,
    } else {
    }
    %c0 = arith.constant 0 : index
    %c0_1 = arith.constant 0 : index
    %3 = vector.load %arg3[%c0, %c0_1] : memref<16x256xf32, #tpu.memory_space<vmem>>, vector<16x256xf32>
    %c0_2 = arith.constant 0 : index
    %c0_3 = arith.constant 0 : index
    %4 = vector.load %arg9[%c0_2, %c0_3] : memref<16x128xf32, #tpu.memory_space<vmem>>, vector<16x128xf32>
    %c0_4 = arith.constant 0 : index
    %c0_5 = arith.constant 0 : index
    %5 = vector.load %arg4[%c0_4, %c0_5] : memref<128x256xf32, #tpu.memory_space<vmem>>, vector<128x256xf32>
    %cst = arith.constant dense<0.000000e+00> : vector<16x128xf32>
    %6 = tpu.matmul %3, %5, %cst {dimension_numbers = #tpu.dot_dimension_numbers<[1], [1], [0], [0], [0, 0, 1, 0], [], []>} : vector<16x256xf32>, vector<128x256xf32>, vector<16x128xf32> -> vector<16x128xf32>
    %7 = arith.addf %4, %6 : vector<16x128xf32>
    %c0_6 = arith.constant 0 : index
    %c0_7 = arith.constant 0 : index
    %8 = vector.load %arg9[%c0_6, %c0_7] : memref<16x128xf32, #tpu.memory_space<vmem>>, vector<16x128xf32>
    tpu.vector_store %arg9[%c0_6, %c0_7], %7 {strides = array<i32>} : memref<16x128xf32, #tpu.memory_space<vmem>>, vector<16x128xf32>,
    %c0_8 = arith.constant 0 : index
    %c0_9 = arith.constant 0 : index
    %9 = vector.load %arg10[%c0_8, %c0_9] : memref<16x8xf32, #tpu.memory_space<vmem>>, vector<16x8xf32>
    %c0_10 = arith.constant 0 : index
    %c0_11 = arith.constant 0 : index
    %10 = vector.load %arg6[%c0_10, %c0_11] : memref<256x8xf32, #tpu.memory_space<vmem>>, vector<256x8xf32>
    %cst_12 = arith.constant dense<0.000000e+00> : vector<16x8xf32>
    %11 = tpu.matmul %3, %10, %cst_12 {dimension_numbers = #tpu.dot_dimension_numbers<[1], [0], [0], [1], [0, 0, 1, 1], [], []>} : vector<16x256xf32>, vector<256x8xf32>, vector<16x8xf32> -> vector<16x8xf32>
    %12 = arith.addf %9, %11 : vector<16x8xf32>
    %c0_13 = arith.constant 0 : index
    %c0_14 = arith.constant 0 : index
    %13 = vector.load %arg10[%c0_13, %c0_14] : memref<16x8xf32, #tpu.memory_space<vmem>>, vector<16x8xf32>
    tpu.vector_store %arg10[%c0_13, %c0_14], %12 {strides = array<i32>} : memref<16x8xf32, #tpu.memory_space<vmem>>, vector<16x8xf32>,
    %c0_i32_15 = arith.constant 0 : i32
    %14 = arith.cmpi eq, %arg2, %c0_i32_15 : i32
    %15 = arith.extui %14 : i1 to i32
    %c0_i32_16 = arith.constant 0 : i32
    %16 = arith.cmpi ne, %15, %c0_i32_16 : i32
    scf.if %16 {
      %c0_17 = arith.constant 0 : index
      %c0_18 = arith.constant 0 : index
      %17 = vector.load %arg10[%c0_17, %c0_18] : memref<16x8xf32, #tpu.memory_space<vmem>>, vector<16x8xf32>
      %cst_19 = arith.constant 2.000000e+00 : f32
      %18 = vector.broadcast %cst_19 : f32 to vector<16x8xf32>
      %19 = arith.mulf %18, %17 : vector<16x8xf32>
      %c0_20 = arith.constant 0 : index
      %c0_21 = arith.constant 0 : index
      %20 = vector.load %arg7[%c0_20, %c0_21] : memref<8x128xf32, #tpu.memory_space<vmem>>, vector<8x128xf32>
      %cst_22 = arith.constant dense<0.000000e+00> : vector<16x128xf32>
      %21 = tpu.matmul %19, %20, %cst_22 {dimension_numbers = #tpu.dot_dimension_numbers<[1], [0], [0], [1], [0, 0, 1, 1], [], []>} : vector<16x8xf32>, vector<8x128xf32>, vector<16x128xf32> -> vector<16x128xf32>
      %c0_23 = arith.constant 0 : index
      %c0_24 = arith.constant 0 : index
      %22 = vector.load %arg9[%c0_23, %c0_24] : memref<16x128xf32, #tpu.memory_space<vmem>>, vector<16x128xf32>
      %c0_25 = arith.constant 0 : index
      %c0_26 = arith.constant 0 : index
      %23 = vector.load %arg5[%c0_25, %c0_26] : memref<1x128xf32, #tpu.memory_space<vmem>>, vector<1x128xf32>
      %24 = vector.broadcast %23 : vector<1x128xf32> to vector<16x128xf32>
      %25 = arith.addf %22, %24 : vector<16x128xf32>
      %26 = arith.addf %25, %21 : vector<16x128xf32>
      %c0_27 = arith.constant 0 : index
      %c0_28 = arith.constant 0 : index
      %27 = vector.load %arg8[%c0_27, %c0_28] : memref<16x128xf32, #tpu.memory_space<vmem>>, vector<16x128xf32>
      tpu.vector_store %arg8[%c0_27, %c0_28], %26 {strides = array<i32>} : memref<16x128xf32, #tpu.memory_space<vmem>>, vector<16x128xf32>,
    } else {
    }
    return
  }
  func.func @transform_0(%arg0: i32, %arg1: i32, %arg2: i32) -> (i32, i32) {
    %c0_i32 = arith.constant 0 : i32
    return %arg0, %arg2 : i32, i32
  }
  func.func @transform_1(%arg0: i32, %arg1: i32, %arg2: i32) -> (i32, i32) {
    %c0_i32 = arith.constant 0 : i32
    return %arg1, %arg2 : i32, i32
  }
  func.func @transform_2(%arg0: i32, %arg1: i32, %arg2: i32) -> (i32, i32) {
    %c0_i32 = arith.constant 0 : i32
    %c0_i32_0 = arith.constant 0 : i32
    return %c0_i32, %arg1 : i32, i32
  }
  func.func @transform_3(%arg0: i32, %arg1: i32, %arg2: i32) -> (i32, i32) {
    %c0_i32 = arith.constant 0 : i32
    %c0_i32_0 = arith.constant 0 : i32
    return %arg2, %c0_i32 : i32, i32
  }
  func.func @transform_4(%arg0: i32, %arg1: i32, %arg2: i32) -> (i32, i32) {
    %c0_i32 = arith.constant 0 : i32
    %c0_i32_0 = arith.constant 0 : i32
    return %c0_i32, %arg1 : i32, i32
  }
  func.func @transform_5(%arg0: i32, %arg1: i32, %arg2: i32) -> (i32, i32) {
    %c0_i32 = arith.constant 0 : i32
    return %arg0, %arg1 : i32, i32
  }
}

</mosaic_0001>

<bundles_post_ra>
// kernel: tpu_custom_call.1
= control target key start
LH: loop header
LB: loop body
LE: loop exit
PB: predicated region body
PF: predicated region fallthrough
CT: control target
= control target key end

     0   :  { %10 = vsyncpa [#allocation5], 0  ;;  %s1557_s0 = inlined_call_operand.vmem [shape: f32[16,256], index: 0, kind: input, shape index: {}]   ;;  %s1558_s1 = inlined_call_operand.hbm [shape: f32[256,256], index: 1, kind: input, shape index: {}]   ;;  %s1559_s2 = inlined_call_operand.vmem [shape: f32[1,256], index: 2, kind: input, shape index: {}]   ;;  %s1560_s3 = inlined_call_operand.vmem [shape: f32[256,8], index: 3, kind: input, shape index: {}]   ;;  %s1561_s4 = inlined_call_operand.vmem [shape: f32[8,256], index: 4, kind: input, shape index: {}]   ;;  %s1562_s5 = inlined_call_operand.hbm [shape: f32[16,256], index: 5, kind: output, shape index: {}]  }
   0x1   :  { %12 = vsyncpa [#allocation5 + $0x1], 0 }
   0x2   :  { %13 = vsyncpa [#allocation6], 0 }
   0x3   :  { %15 = vsyncpa [#allocation6 + $0x1], 0  ;;  %s1225_s18 = smov 0   ;;  %s1227_s19 = smov 0  }
   0x4   :  { %s1229_s20 = smov 0   ;;  %s1231_s21 = smov 0  }
   0x5   :  { %s1233_s22 = smov 0   ;;  %s1235_s23 = smov 0  }
   0x6 LB: > { %s872_s24 = sadd.s32 4294967295, %s1185_s23   ;;  %s873_s25 = sadd.s32 4294967294, %s1185_s23   ;;  %s1185_s23 = sphi %s1235_s23, %s21_s23   ;;  %s1181_s22 = sphi %s1233_s22, %s1577_s22   ;;  %s1177_s21 = sphi %s1231_s21, %s1576_s21   ;;  %s1173_s20 = sphi %s1229_s20, %s1575_s20   ;;  %s1169_s19 = sphi %s1227_s19, %s1574_s19   ;;  %s1165_s18 = sphi %s1225_s18, %s1573_s18  }
   0x7   : > { %s36_s26 = sadd.s32 1, %s1181_s22  ;;  %s77_s27 = sadd.s32 1, %s1173_s20 }
   0x8   : > { %p38_p0 = scmp.ge.s32.totalorder %s36_s26, 2  ;;  %p84_p1 = scmp.ne.s32.totalorder %s1173_s20, %s1169_s19 }
   0x9   : > { %p85_p2 = scmp.eq.s32.totalorder %s1185_s23, 0  ;;  %p90_p3 = scmp.ne.s32.totalorder %s1169_s19, %s1165_s18 }
   0xa   : > { %s1579_s26 = smov (%p38_p0, %s36_s26), 0  ;;  %p91_p5 = scmp.eq.s32.totalorder %s872_s24, 0 }
   0xb   : > { %p1266_p4 = por %p85_p2, %p84_p1  ;;  %s72_s29 = ssub.s32 %s1181_s22, %s1579_s26 }
   0xc   : > { %p194_p6 = scmp.eq.s32.totalorder %s872_s24, 1  ;;  %p75_p7 = scmp.eq.s32.totalorder %s72_s29, 0 }
   0xd   : > { %p1272_p8 = por %p91_p5, %p90_p3  ;;  %p200_p10 = scmp.eq.s32.totalorder %s873_s25, 1 }
   0xe   : > { %p1276_p9 = por %p194_p6, %p84_p1  ;;  %p1017_p13 = scmp.lt.s32.totalorder %s1185_s23, 2 }
   0xf   : > { %s1281_s7 = scalar_select %p75_p7, %s1173_s20, %s77_s27  }
  0x10   : > { %s1566_s6 = scalar_select %p1276_p9, 1, 0 }
  0x11   : > { %p1283_p11 = por %p200_p10, %p90_p3  ;;  %s244_s9 = sand.u32 1, %s1173_s20  }
  0x12   : > { %s878_s10 = sshll.u32 %s244_s9, 8  ;;  %s894_s11 = sshll.u32 %s1181_s22, 12 }
  0x13   : > { %s1567_s8 = scalar_select %p1283_p11, 1, 0 }
  0x14   : > { %s1294_s14 = scalar_lea.hbm %s1558_s1, %s894_s11  ;;  %s248_s15 = scalar_lea.vmem [#allocation4], %s878_s10 }
  0x15   : > { %s258_s16 = sshll.u32 %s248_s15, 4  ;;  %p1300_p0 = pnand %p1017_p13, %p1266_p4  ;;  %s1296_s16 = int_to_ptr.vmem [resolvable:$true] %s258_s16 }
  0x16   : > { %s1305_s24 = scalar_lea.sflag [#allocation5], %s244_s9  ;;  %s1073_s25 = scalar_lea.hbm %s1294_s14, 4096 }
  0x17   : > { %p1074_p2 = scmp.ne.s32.totalorder %s1294_s14, %s1073_s25  ;;  %p1075_p3 = pneg %p1300_p0 }
  0x18   : > { %s1078_s28 = scalar_lea.hbm %s1558_s1, 8192  ;;  %p1079_p4 = scmp.lt.u32.totalorder %s1294_s14, %s1558_s1 }
  0x19   : > { %p1076_p5 = pnand %p1075_p3, %p1074_p2  ;;  %p1080_p7 = scmp.lt.u32.totalorder %s1078_s28, %s1073_s25 }
  0x1a   : > { %p1082_p13 = scmp.lt.u32.totalorder %s1073_s25, %s1294_s14 }
  0x1b   : > { %p1077_p6 = pneg %p1076_p5  ;;  %p1081_p10 = por %p1080_p7, %p1079_p4 }
  0x1d   : > { %p1083_p12 = por %p1082_p13, %p1081_p10 }
  0x1f   : > { %p1084_p1 = pnand %p1083_p12, %p1077_p6 }
  0x21   : > { %1087 = shalt.err (!%p1084_p1)
}
  0x22   : > { %s1088_s9 = scalar_lea.vmem %s1296_s16, 4096  ;;  %s1187_s12 = smov [#allocation4]  }
  0x23   : > { %p1089_p2 = scmp.ne.s32.totalorder %s1296_s16, %s1088_s9  ;;  %s1093_s13 = sshll.u32 %s1187_s12, 4  ;;  %s1094_s13 = int_to_ptr.vmem [resolvable:$false] %s1093_s13 }
  0x24   : > { %s1095_s15 = scalar_lea.vmem %s1094_s13, 8192  ;;  %p1096_p9 = scmp.lt.s32.totalorder %s1296_s16, %s1094_s13 }
  0x25   : > { %p1091_p5 = pnand %p1089_p2, %p1075_p3  ;;  %p1097_p4 = scmp.lt.s32.totalorder %s1095_s15, %s1088_s9 }
  0x27   : > { %p1092_p11 = pneg %p1091_p5  ;;  %p1098_p7 = por %p1097_p4, %p1096_p9 }
  0x29   : > { %p1099_p10 = pnand %p1098_p7, %p1092_p11 }
  0x2b   : > { %1102 = shalt.err (!%p1099_p10)
}
  0x2c   : > { %s1188_s25 = smov 256   ;;  %s1189_s27 = smov 16  }
  0x2d   : > { %1012 = dma.hbm_to_vmem [thread:$0]  (!%p1300_p0), %s1294_s14, 4096, %s1296_s16, %s1305_s24, %s1188_s25, %s1188_s25, %s1189_s27  }
  0x2e   : > { %p279_p12 = scmp.lt.s32.totalorder %s1185_s23, 3  ;;  %p1569_p1 = scmp.ge.s32.totalorder %s1185_s23, 1 }
  0x30   : > { %p280_p3 = pnand %p1569_p1, %p279_p12 }
  0x31   : > { %s1337_s29 = sand.u32 (!%p280_p3), 1, %s1169_s19  }
  0x32   : > { %283 = sbr.rel (%p280_p3) target bundleno = 555 (0x22b), region = 40  ;;  %s883_s28 = sshll.u32 (!%p280_p3), %s1337_s29, 8 }
  0x33   : > { %s286_s10 = scalar_lea.sflag (!%p280_p3), [#allocation5], %s1337_s29  ;;  %s1341_s11 = scalar_lea.vmem (!%p280_p3), [#allocation4], %s883_s28 }
  0x39   : > { %1156 = dma.done.wait (%p1272_p8), %s286_s10, 4096  }
  0x3a   : > { %1158 = vsyncadd (%p1272_p8), %s286_s10, 4294963200  ;;  %v510_v0 = vld [vmem:[%s1560_s3 + $0x80] sm:$0xff]  ;;  %v511_v1 = vld [vmem:[%s1560_s3 + $0x88] sm:$0xff]  ;;  %vm372_vm0 = vcmask 64512   ;;  %p352_p8 = scmp.lt.s32.totalorder %s1177_s21, 1  ;;  %s884_s16 = sshll.u32 %s1337_s29, 4 }
  0x3b   : > { %v494_v2 = vld [vmem:[%s1560_s3] sm:$0xff]  ;;  %v973_v3 = vpack.c.bf16 %v511_v1, %v510_v0  ;;  %v495_v4 = vld [vmem:[%s1560_s3 + $0x8] sm:$0xff]  ;;  %v512_v5 = vld [vmem:[%s1560_s3 + $0x90] sm:$0xff]  ;;  %s337_s17 = scalar_lea.vmem [#allocation7], %s884_s16  ;;  %s890_s9 = sshll.u32 %s1177_s21, 7 }
  0x3c   : > { %v513_v6 = vld [vmem:[%s1560_s3 + $0x98] sm:$0xff]  ;;  %v975_v7 = vpack.c.bf16 %v495_v4, %v494_v2  ;;  %v496_v9 = vld [vmem:[%s1560_s3 + $0x10] sm:$0xff]  ;;  %v514_v11 = vld [vmem:[%s1560_s3 + $0xa0] sm:$0xff]  ;;  %s353_s15 = scalar_select %p352_p8, %s1177_s21, 1 }
  0x3d   : > { %v977_v8 = vpack.c.bf16 %v513_v6, %v512_v5  ;;  %v497_v10 = vld [vmem:[%s1560_s3 + $0x18] sm:$0xff]  ;;  %974 = vmatprep.subr.bf16.mxu1 %v973_v3  ;;  %v515_v12 = vld [vmem:[%s1560_s3 + $0xa8] sm:$0xff]  ;;  %v498_v15 = vld [vmem:[%s1560_s3 + $0x20] sm:$0xff]  ;;  %s726_s24 = sshll.u32 %s337_s17, 4  ;;  %p1570_p11 = scmp.ne.s32.totalorder %s1566_s6, 0  ;;  %s1503_s24 = int_to_ptr.vmem [resolvable:$true] %s726_s24 }
  0x3e   : > { %976 = vmatpush3.bf16.msra.mxu1 %v975_v7  ;;  %v979_v13 = vpack.c.bf16 %v497_v10, %v496_v9  ;;  %v981_v14 = vpack.c.bf16 %v515_v12, %v514_v11  ;;  %v499_v16 = vld [vmem:[%s1560_s3 + $0x28] sm:$0xff]  ;;  %v516_v17 = vld [vmem:[%s1560_s3 + $0xb0] sm:$0xff]  ;;  %v517_v18 = vld [vmem:[%s1560_s3 + $0xb8] sm:$0xff]  ;;  %s885_s25 = sshll.u32 %s353_s15, 3  ;;  %s354_s14 = scalar_lea.vmem %s1559_s2, %s353_s15 }
  0x3f   : > { %978 = vmatprep.subr.bf16.mxu1 %v977_v8  ;;  %v983_v19 = vpack.c.bf16 %v499_v16, %v498_v15  ;;  %v985_v20 = vpack.c.bf16 %v517_v18, %v516_v17  ;;  %v500_v21 = vld [vmem:[%s1560_s3 + $0x30] sm:$0xff]  ;;  %v501_v22 = vld [vmem:[%s1560_s3 + $0x38] sm:$0xff]  ;;  %v518_v23 = vld [vmem:[%s1560_s3 + $0xc0] sm:$0xff]  ;;  %s364_s28 = scalar_lea.vmem %s1561_s4, %s885_s25  ;;  %s1508_s15 = scalar_lea.hbm %s1562_s5, %s890_s9 }
  0x40   : > { %v519_v24 = vld [vmem:[%s1560_s3 + $0xc8] sm:$0xff]  ;;  %v502_v26 = vld [vmem:[%s1560_s3 + $0x40] sm:$0xff]  ;;  %v987_v28 = vpack.c.bf16 %v501_v22, %v500_v21  ;;  %v382_v29 = vld [vmem:[%s1341_s11 + $0x8] sm:$0xff]  ;;  %s711_s25 = scalar_lea.sflag [#allocation6], %s1337_s29  ;;  %s1103_s30 = scalar_lea.vmem %s1503_s24, 256 }
  0x41   : > { %v376_v25 = vld [vmem:[%s1557_s0 + $0x8] sm:$0xff]  ;;  %v381_v31 = vld [vmem:[%s1341_s11] sm:$0xff]  ;;  %v989_v32 = vpack.c.bf16 %v519_v24, %v518_v23  ;;  %v383_v34 = vld [vmem:[%s1341_s11 + $0x10] sm:$0xff]  ;;  %p1104_p9 = scmp.ne.s32.totalorder %s1503_s24, %s1103_s30  ;;  %s1191_s21 = smov [#allocation7]  }
  0x42   : > { %980 = vmatpush3.bf16.msra.mxu1 %v979_v13  ;;  %v503_v27 = vld [vmem:[%s1560_s3 + $0x48] sm:$0xff]  ;;  %590 = vmatprep.mubr.f32.mxu1 %v376_v25  ;;  %v386_v35 = vld [vmem:[%s1341_s11 + $0x28] sm:$0xff]  ;;  %v520_v37 = vld [vmem:[%s1560_s3 + $0xd0] sm:$0xff]  ;;  %v943_v39 = vpack.c.bf16 %v383_v34, %v381_v31  ;;  %s1107_s27 = sshll.u32 %s1191_s21, 4  ;;  %s1108_s27 = int_to_ptr.vmem [resolvable:$false] %s1107_s27 }
  0x43   : > { %982 = vmatprep.subr.bf16.mxu1 %v981_v14  ;;  %477 = vmatprep.mubr.f32.mxu0 %v376_v25  ;;  %v384_v30 = vld [vmem:[%s1341_s11 + $0x18] sm:$0xff]  ;;  %v521_v38 = vld [vmem:[%s1560_s3 + $0xd8] sm:$0xff]  ;;  %v991_v41 = vpack.c.bf16 %v503_v27, %v502_v26  ;;  %v504_v42 = vld [vmem:[%s1560_s3 + $0x50] sm:$0xff]  ;;  %p1105_p0 = pnand %p1104_p9, %p1570_p11  ;;  %p1110_p13 = scmp.lt.s32.totalorder %s1503_s24, %s1108_s27 }
  0x44   : > { %v941_v33 = vpack.c.bf16 %v384_v30, %v382_v29  ;;  %v388_v36 = vld [vmem:[%s1341_s11 + $0x38] sm:$0xff]  ;;  %v505_v43 = vld [vmem:[%s1560_s3 + $0x58] sm:$0xff]  ;;  %v993_v44 = vpack.c.bf16 %v521_v38, %v520_v37  ;;  %v522_v45 = vld [vmem:[%s1560_s3 + $0xe0] sm:$0xff]  ;;  %v1190_v30 = vmov 0.0  }
  0x45   : > { %v945_v40 = vpack.c.bf16 %v388_v36, %v386_v35  ;;  %v385_v46 = vld [vmem:[%s1341_s11 + $0x20] sm:$0xff]  ;;  %v387_v47 = vld [vmem:[%s1341_s11 + $0x30] sm:$0xff]  ;;  %v523_v48 = vld [vmem:[%s1560_s3 + $0xe8] sm:$0xff]  ;;  %v995_v51 = vpack.c.bf16 %v505_v43, %v504_v42  ;;  %373 = vst.msk [vmem:[#allocation3] sm:$0xff] %vm372_vm0, %v1190_v30  ;;  %p1106_p6 = pneg %p1105_p0 }
  0x46   : > { %984 = vmatpush3.bf16.msra.mxu1 %v983_v19  ;;  %942 = vmatprep.subr.bf16.mxu0 %v941_v33  ;;  %v390_v49 = vld [vmem:[%s1341_s11 + $0x48] sm:$0xff]  ;;  %v392_v50 = vld [vmem:[%s1341_s11 + $0x58] sm:$0xff]  ;;  %v947_v52 = vpack.c.bf16 %v387_v47, %v385_v46  ;;  %v997_v53 = vpack.c.bf16 %v523_v48, %v522_v45  ;;  %v506_v54 = vld [vmem:[%s1560_s3 + $0x60] sm:$0xff]  ;;  %374 = vst.msk [vmem:[#allocation3 + $0x8] sm:$0xff] %vm372_vm0, %v1190_v30 }
  0x47   : > { %986 = vmatprep.subr.bf16.mxu1 %v985_v20  ;;  %944 = vmatpush1.bf16.xpose.msra.mxu0 %v943_v39  ;;  %v507_v55 = vld [vmem:[%s1560_s3 + $0x68] sm:$0xff]  ;;  %v949_v56 = vpack.c.bf16 %v392_v50, %v390_v49  ;;  %v524_v57 = vld [vmem:[%s1560_s3 + $0xf0] sm:$0xff]  ;;  %v525_v58 = vld [vmem:[%s1560_s3 + $0xf8] sm:$0xff] }
  0x48   : > { %946 = vmatprep.subr.bf16.mxu0 %v945_v40  ;;  %v999_v59 = vpack.c.bf16 %v507_v55, %v506_v54  ;;  %v508_v60 = vld [vmem:[%s1560_s3 + $0x70] sm:$0xff]  ;;  %v1001_v61 = vpack.c.bf16 %v525_v58, %v524_v57  ;;  %v509_v62 = vld [vmem:[%s1560_s3 + $0x78] sm:$0xff]  ;;  %v391_v0 = vld [vmem:[%s1341_s11 + $0x50] sm:$0xff] }
  0x49   : > { %v389_v63 = vld [vmem:[%s1341_s11 + $0x40] sm:$0xff]  ;;  %v394_v1 = vld [vmem:[%s1341_s11 + $0x68] sm:$0xff]  ;;  %v396_v2 = vld [vmem:[%s1341_s11 + $0x78] sm:$0xff]  ;;  %v1003_v3 = vpack.c.bf16 %v509_v62, %v508_v60 }
  0x4a   : > { %988 = vmatpush3.bf16.msra.mxu1 %v987_v28  ;;  %v951_v4 = vpack.c.bf16 %v391_v0, %v389_v63  ;;  %v953_v5 = vpack.c.bf16 %v396_v2, %v394_v1  ;;  %v375_v6 = vld [vmem:[%s1557_s0] sm:$0xff]  ;;  %v378_v7 = vld [vmem:[%s1557_s0 + $0x18] sm:$0xff]  ;;  %v393_v8 = vld [vmem:[%s1341_s11 + $0x60] sm:$0xff] }
  0x4b   : > { %990 = vmatprep.subr.bf16.mxu1 %v989_v32  ;;  %v395_v9 = vld [vmem:[%s1341_s11 + $0x70] sm:$0xff]  ;;  %v398_v10 = vld [vmem:[%s1341_s11 + $0x88] sm:$0xff]  ;;  %v400_v11 = vld [vmem:[%s1341_s11 + $0x98] sm:$0xff] }
  0x4c   : > { %v377_v12 = vld [vmem:[%s1557_s0 + $0x10] sm:$0xff]  ;;  %v955_v13 = vpack.c.bf16 %v395_v9, %v393_v8  ;;  %v957_v14 = vpack.c.bf16 %v400_v11, %v398_v10  ;;  %v399_v16 = vld [vmem:[%s1341_s11 + $0x90] sm:$0xff]  ;;  %v402_v17 = vld [vmem:[%s1341_s11 + $0xa8] sm:$0xff] }
  0x4d   : > { %v397_v15 = vld [vmem:[%s1341_s11 + $0x80] sm:$0xff]  ;;  %v404_v18 = vld [vmem:[%s1341_s11 + $0xb8] sm:$0xff]  ;;  %v403_v22 = vld [vmem:[%s1341_s11 + $0xb0] sm:$0xff] }
  0x4e   : > { %992 = vmatpush3.bf16.msra.mxu1 %v991_v41  ;;  %v959_v19 = vpack.c.bf16 %v399_v16, %v397_v15  ;;  %v961_v20 = vpack.c.bf16 %v404_v18, %v402_v17  ;;  %v401_v21 = vld [vmem:[%s1341_s11 + $0xa0] sm:$0xff]  ;;  %v406_v23 = vld [vmem:[%s1341_s11 + $0xc8] sm:$0xff]  ;;  %v408_v24 = vld [vmem:[%s1341_s11 + $0xd8] sm:$0xff] }
  0x4f   : > { %994 = vmatprep.subr.bf16.mxu1 %v993_v44  ;;  %948 = vmatpush1.bf16.xpose.msra.mxu0 %v947_v52  ;;  %v963_v25 = vpack.c.bf16 %v403_v22, %v401_v21  ;;  %v965_v26 = vpack.c.bf16 %v408_v24, %v406_v23  ;;  %v405_v27 = vld [vmem:[%s1341_s11 + $0xc0] sm:$0xff]  ;;  %v407_v28 = vld [vmem:[%s1341_s11 + $0xd0] sm:$0xff]  ;;  %v410_v31 = vld [vmem:[%s1341_s11 + $0xe8] sm:$0xff] }
  0x50   : > { %950 = vmatprep.subr.bf16.mxu0 %v949_v56  ;;  %v967_v29 = vpack.c.bf16 %v407_v28, %v405_v27  ;;  %v412_v32 = vld [vmem:[%s1341_s11 + $0xf8] sm:$0xff]  ;;  %v409_v34 = vld [vmem:[%s1341_s11 + $0xe0] sm:$0xff]  ;;  %v411_v35 = vld [vmem:[%s1341_s11 + $0xf0] sm:$0xff] }
  0x51   : > { %v969_v33 = vpack.c.bf16 %v412_v32, %v410_v31  ;;  %v971_v36 = vpack.c.bf16 %v411_v35, %v409_v34  ;;  %v613_v37 = vld [vmem:[%s364_s28] sm:$0xff]  ;;  %v493_v44 = vld [vmem:[#allocation3 + $0x8] sm:$0xff]  ;;  %s1109_s28 = scalar_lea.vmem %s1108_s27, 512 }
  0x52   : > { %996 = vmatpush3.bf16.msra.mxu1 %v995_v51  ;;  %v492_v39 = vld [vmem:[#allocation3] sm:$0xff]  ;;  %p1111_p2 = scmp.lt.s32.totalorder %s1109_s28, %s1103_s30 }
  0x53   : > { %998 = vmatprep.subr.bf16.mxu1 %v997_v53  ;;  %v888_v52 = vld [vmem:[%s354_s14] ss:$0 sm:$0xff] }
  0x54   : > { %p1112_p5 = por %p1111_p2, %p1110_p13 }
  0x56   : > { %1000 = vmatpush3.bf16.msra.mxu1 %v999_v59  ;;  %p1113_p4 = pnand %p1112_p5, %p1106_p6 }
  0x57   : > { %1002 = vmatprep.subr.bf16.mxu1 %v1001_v61  ;;  %952 = vmatpush1.bf16.xpose.msra.mxu0 %v951_v4 }
  0x58   : > { %954 = vmatprep.subr.bf16.mxu0 %v953_v5 }
  0x5a   : > { %1004 = vmatpush3.bf16.msra.mxu1 %v1003_v3 }
  0x5b   : > { %936 = vmatprep.subr.mxu1 %v613_v37 }
  0x5d   : > { %591 = vmatmul.mubr.f32.vlgmr.msra.gmra.mrb[0].mxu1 %v375_v6 }
  0x5e   : > { %595 = vmatprep.mubr.f32.mxu1 %v378_v7  ;;  %937 = vmatpush3.msra.mxu1 %v613_v37 }
  0x5f   : > { %956 = vmatpush1.bf16.xpose.msra.mxu0 %v955_v13 }
  0x60   : > { %958 = vmatprep.subr.bf16.mxu0 %v957_v14 }
  0x61   : > { %596 = vmatmul.mubr.f32.gmra.mrb[2].mxu1 %v377_v12 }
  0x67   : > { %960 = vmatpush1.bf16.xpose.msra.mxu0 %v959_v19 }
  0x68   : > { %962 = vmatprep.subr.bf16.mxu0 %v961_v20 }
  0x6f   : > { %964 = vmatpush1.bf16.xpose.msra.mxu0 %v963_v25 }
  0x70   : > { %966 = vmatprep.subr.bf16.mxu0 %v965_v26 }
  0x77   : > { %968 = vmatpush1.bf16.xpose.msra.mxu0 %v967_v29 }
  0x78   : > { %970 = vmatprep.subr.bf16.mxu0 %v969_v33 }
  0x7f   : > { %972 = vmatpush1.bf16.xpose.msra.mxu0 %v971_v36 }
  0x86   : > { %478 = vmatmul.mubr.f32.vlgmr.msra.gmra.mrb[0].mxu0 %v375_v6 }
  0x87   : > { %482 = vmatprep.mubr.f32.mxu0 %v378_v7 }
  0x8a   : > { %483 = vmatmul.mubr.f32.gmra.mrb[2].mxu0 %v377_v12 }
 0x130   : > { %v927_v38 = vpop.f32.mrb[0].mxu1 }
 0x131   : > { %v928_v40 = vpop.f32.mrb[1].mxu1 }
 0x132   : > { %v929_v41 = vadd.f32 %v928_v40, %v927_v38 }
 0x134   : > { %v601_v42 = vadd.f32 %v929_v41, %v492_v39  ;;  %v930_v43 = vpop.f32.mrb[2].mxu1 }
 0x135   : > { %v931_v45 = vpop.f32.mrb[3].mxu1 }
 0x136   : > { %604 = vst.msk [vmem:[#allocation3] sm:$0xff] %vm372_vm0, %v601_v42  ;;  %v932_v46 = vadd.f32 %v931_v45, %v930_v43 }
 0x138   : > { %v602_v47 = vadd.f32 %v932_v46, %v493_v44 }
 0x13a   : > { %605 = vst.msk [vmem:[#allocation3 + $0x8] sm:$0xff] %vm372_vm0, %v602_v47 }
 0x13d   : > { %v609_v48 = vld [vmem:[#allocation3] sm:$0xff] }
 0x13e   : > { %v611_v49 = vmul.f32 2.0, %v609_v48 }
 0x140   : > { %938 = vmatprep.mubr.msk.f32.mxu1 %vm372_vm0, %v611_v49 }
 0x141   : > { %v610_v50 = vld [vmem:[#allocation3 + $0x8] sm:$0xff] }
 0x142   : > { %v612_v51 = vmul.f32 2.0, %v610_v50 }
 0x144   : > { %939 = vmatmul.mubr.msk.f32.vlgmr.msra.gmra.mrb[4].mxu1 %vm372_vm0, %v612_v51 }
 0x159   : > { %v479_v53 = vpop.f32.mrb[0].mxu0 }
 0x15a   : > { %v704_v54 = vadd.f32 %v888_v52, %v479_v53  ;;  %v481_v55 = vpop.f32.mrb[1].mxu0 }
 0x15d   : > { %v484_v56 = vpop.f32.mrb[2].mxu0 }
 0x15e   : > { %v705_v57 = vadd.f32 %v888_v52, %v484_v56  ;;  %v486_v58 = vpop.f32.mrb[3].mxu0 }
 0x217   : > { %v940_v59 = vpop.f32.mrb[4].mxu1 }
 0x218   : > { %v707_v60 = vadd.f32 %v940_v59, %v705_v57  ;;  %v686_v61 = vpop.f32.mrb[5].mxu1 }
 0x219   : > { %v706_v62 = vadd.f32 %v704_v54, %v686_v61 }
 0x21a   : > { %709 = vst [vmem:[%s337_s17 + $0x8] sm:$0xff] %v707_v60 }
 0x21b   : > { %708 = vst [vmem:[%s337_s17] sm:$0xff] %v706_v62 }
 0x21c   : > { %1116 = shalt.err (!%p1113_p4)
}
 0x21d   : > { %s1117_s11 = scalar_lea.hbm %s1508_s15, 256  ;;  %s1121_s16 = scalar_lea.hbm %s1562_s5, 512 }
 0x21e   : > { %p1118_p7 = scmp.ne.s32.totalorder %s1508_s15, %s1117_s11  ;;  %p1122_p1 = scmp.lt.u32.totalorder %s1508_s15, %s1562_s5 }
 0x21f   : > { %p1123_p3 = scmp.lt.u32.totalorder %s1121_s16, %s1117_s11  ;;  %p1125_p9 = scmp.lt.u32.totalorder %s1117_s11, %s1508_s15 }
 0x220   : > { %p1119_p10 = pnand %p1118_p7, %p1570_p11 }
 0x221   : > { %p1124_p8 = por %p1123_p3, %p1122_p1 }
 0x222   : > { %p1120_p12 = pneg %p1119_p10 }
 0x223   : > { %p1126_p0 = por %p1125_p9, %p1124_p8 }
 0x225   : > { %p1127_p6 = pnand %p1126_p0, %p1120_p12 }
 0x227   : > { %1130 = shalt.err (!%p1127_p6)
}
 0x228   : > { %s1192_s12 = smov 128   ;;  %s1193_s13 = smov 256  }
 0x229   : > { %s1194_s30 = smov 8  }
 0x22a   : > { %1007 = dma.vmem_to_hbm [thread:$0]  (%p1570_p11), %s1503_s24, 256, %s1508_s15, %s711_s25, %s1192_s12, %s1193_s13, %s1194_s30  }
 0x22b PF: > { %s741_s21 = sand.u32 1, %s1165_s18   ;;  %p1571_p13 = scmp.ne.s32.totalorder %s1567_s8, 0 }
 0x22c   : > { %p1572_p2 = scmp.ge.s32.totalorder %s1185_s23, 2  ;;  %s742_s27 = scalar_lea.sflag [#allocation6], %s741_s21 }
 0x22e   : > { %p1014_p5 = pnand %p1572_p2, %p1571_p13 }
 0x230   : > { %1160 = dma.done.wait (!%p1014_p5), %s742_s27, 256  }
 0x231   : > { %1162 = vsyncadd (!%p1014_p5), %s742_s27, 4294967040  ;;  %s21_s23 = sadd.s32 1, %s1185_s23   ;;  %s1573_s18 = smov %s1169_s19 }
 0x232   : > { %p18_p4 = scmp.ge.s32.totalorder %s21_s23, 4   ;;  %s1574_s19 = smov %s1173_s20 }
 0x233   : > { %s1575_s20 = smov %s1281_s7  ;;  %s1576_s21 = smov %s1181_s22 }
 0x234   : > { %s1577_s22 = smov %s1579_s26  ;;  %20 = sbr.rel (!%p18_p4) target bundleno = 6 (0x6), region = 105 }
 0x23b   :  { %747 = vsyncpa [#allocation5], 1 }
 0x23c   :  { %749 = vsyncpa [#allocation5 + $0x1], 1 }
 0x23d   :  { %750 = vsyncpa [#allocation6], 1 }
 0x23e   :  { %752 = vsyncpa [#allocation6 + $0x1], 1 }

</bundles_post_ra>
